<compile_context>
chip_gen: v6e
topology: v6e:2x2x1
jax: 0.10.0
libtpu: 0.0.40
codegen_flags: <defaults>
</compile_context>

<pallas_src>
import functools

import jax
import jax.numpy as jnp
from jax.experimental import pallas as pl
from jax.experimental.pallas import tpu as pltpu

_LANE = 128  # lane width (last-dim tiling unit)


def _round_up(n, m):
    return ((n + m - 1) // m) * m


def _pad_axis(a, axis, target):
    pad = target - a.shape[axis]
    if pad == 0:
        return a
    widths = [(0, 0)] * a.ndim
    widths[axis] = (0, pad)
    return jnp.pad(a, widths)


def _vmem_budgets():
    """Generation-aware VMEM planning (v5e/v6e: 128 MiB, v7x: 64 MiB per TC)."""
    cap = 64 * 1024 * 1024  # conservative fallback (v7x per-TC physical VMEM)
    try:
        info = pltpu.get_tpu_info()
        cap = int(getattr(info, "vmem_capacity_bytes", cap)) or cap
    except Exception:
        pass
    vmem_limit = (cap * 3) // 4    # scoped VMEM requested from Mosaic
    tile_budget = (cap * 11) // 20  # what the tile planner may use (leaves slack)
    return tile_budget, vmem_limit


def _pick_tiles(n_rows, emb, hid_p, out_p, x_isz, w_isz, c_isz, o_isz,
                row_gran, budget):
    """Pick (tm, tn): row tile and out-feature tile.

    Preference order:
      1. fully-resident w1 (tn == out_p; no w1 restream across row tiles) as
         long as the row tile can stay >= 256 (or the full row count),
      2. otherwise the largest tm (cuts per-row-tile w1 restreaming), then the
         largest tn (fewer grid steps, lane-dense stores).
    The budget accounts for default double-buffering, the h-cache scratch and
    the main compiler temporaries (x cast, f32 h, f32 y).
    """
    tm_cap = _round_up(min(max(n_rows, 1), 2048), row_gran)
    row_cands = []
    for c in (2048, 1024, 512, 256, 128, 64, 32, 16):
        c = min(c, tm_cap)
        if c not in row_cands:
            row_cands.append(c)
    tn_cands = [out_p] + [t for t in (1024, 512, 256, 128) if t < out_p]

    def fits(tm, tn):
        fixed = 2 * (emb * hid_p * w_isz + hid_p * 4)      # w0 + b0 (dbl-buf)
        w1b = 2 * (hid_p * tn * w_isz + tn * 4)            # w1/b1 tile (dbl-buf)
        io = 2 * tm * (emb * x_isz + tn * o_isz)           # x / out tiles (dbl-buf)
        scratch = tm * hid_p * c_isz                       # h cache (single)
        temps = tm * (emb * c_isz + hid_p * 4 + tn * 4)    # casts / f32 intermediates
        return fixed + w1b + io + scratch + temps <= budget

    # 1) resident w1 if it leaves room for a reasonable row tile.
    for tm in row_cands:
        if fits(tm, out_p):
            if tm >= min(256, tm_cap):
                return tm, out_p
            break
    # 2) maximize tm, then tn.
    for tm in row_cands:
        for tn in tn_cands:
            if fits(tm, tn):
                return tm, tn
    # 3) last resort (tiny shapes / tiny budget).
    return row_cands[-1], 128


def _decoder_kernel(x_ref, w0_ref, b0_ref, w1_ref, b1_ref, o_ref, h_ref):
    # Hidden activation is computed once per row tile (first out-feature step)
    # and cached in VMEM scratch already cast to the MXU compute dtype.
    @pl.when(pl.program_id(1) == 0)
    def _():
        x = x_ref[...].astype(w0_ref.dtype)  # in-kernel cast: x stays f32 in HBM
        h = jnp.dot(x, w0_ref[...], preferred_element_type=jnp.float32)
        h = jnp.maximum(h + b0_ref[...], 0.0)  # f32 bias + ReLU epilogue
        h_ref[...] = h.astype(h_ref.dtype)

    # l1: cached h @ w1 out-tile on the MXU, f32 accumulation, f32 bias.
    y = jnp.dot(h_ref[...], w1_ref[...], preferred_element_type=jnp.float32)
    o_ref[...] = (y + b1_ref[...]).astype(o_ref.dtype)


@functools.partial(jax.jit, static_argnames=("compute_dtype",))
def decoder_forward(x, w0, b0, w1, b1, *, compute_dtype=None):
    """x: [..., emb] -> [..., out]; matches nn.Linear semantics on last dim.

    Weights are pre-transposed vs. torch.nn.Linear: w0 [emb, hidden],
    w1 [hidden, out]. bf16 compute (compute_dtype=jnp.bfloat16) is recommended
    on all generations (f32 accumulation + f32 epilogue, so v5e is fine too).
    For best performance store w0/w1 persistently in compute_dtype so the
    in-wrapper cast is a no-op; x itself is never cast in the wrapper.
    """
    orig_shape = x.shape
    out_dtype = x.dtype
    emb = orig_shape[-1]
    hidden = w0.shape[1]
    out = w1.shape[1]

    if compute_dtype is None:
        compute_dtype = x.dtype
    compute_dtype = jnp.dtype(compute_dtype)

    # Weight/bias dtypes (no-ops if already stored this way).
    w0 = w0.astype(compute_dtype)
    w1 = w1.astype(compute_dtype)
    b0 = b0.astype(jnp.float32)
    b1 = b1.astype(jnp.float32)

    # Only the MXU-N / output-lane dims get padded to 128-multiples; x keeps
    # its exact HBM shape (emb is a full-dim block, rows use partial blocks).
    hid_p = _round_up(hidden, _LANE)
    out_p = _round_up(out, _LANE)

    x2d = x.reshape(-1, emb)
    n_rows = x2d.shape[0]

    x_isz = jnp.dtype(x.dtype).itemsize
    c_isz = compute_dtype.itemsize
    o_isz = jnp.dtype(out_dtype).itemsize
    row_gran = 16 if min(x_isz, c_isz, o_isz) < 4 else 8

    tile_budget, vmem_limit = _vmem_budgets()
    tm, tn = _pick_tiles(n_rows, emb, hid_p, out_p,
                         x_isz, c_isz, c_isz, o_isz, row_gran, tile_budget)

    # Pad the out-feature dim up to a multiple of tn so every out tile (and
    # every output store) is a full, lane-dense block.
    out_pt = _round_up(out_p, tn)

    w0p = _pad_axis(w0, 1, hid_p)
    b0p = _pad_axis(b0.reshape(1, hidden), 1, hid_p)
    w1p = _pad_axis(_pad_axis(w1, 0, hid_p), 1, out_pt)
    b1p = _pad_axis(b1.reshape(1, out), 1, out_pt)

    grid = (pl.cdiv(n_rows, tm), out_pt // tn)

    y2d = pl.pallas_call(
        _decoder_kernel,
        out_shape=jax.ShapeDtypeStruct((n_rows, out_pt), out_dtype),
        grid=grid,
        in_specs=[
            pl.BlockSpec((tm, emb), lambda i, j: (i, 0)),     # x row tile
            pl.BlockSpec((emb, hid_p), lambda i, j: (0, 0)),  # w0 (resident)
            pl.BlockSpec((1, hid_p), lambda i, j: (0, 0)),    # b0 (resident)
            pl.BlockSpec((hid_p, tn), lambda i, j: (0, j)),   # w1 out tile
            pl.BlockSpec((1, tn), lambda i, j: (0, j)),       # b1 out tile
        ],
        out_specs=pl.BlockSpec((tm, tn), lambda i, j: (i, j)),
        scratch_shapes=[pltpu.VMEM((tm, hid_p), compute_dtype)],  # h cache
        compiler_params=pltpu.CompilerParams(
            # Rows stay "parallel" (megacore sharding on v7x); the out axis is
            # "arbitrary" so the h-cache carry across j is legal.
            dimension_semantics=("parallel", "arbitrary"),
            vmem_limit_bytes=vmem_limit,
        ),
    )(x2d, w0p, b0p, w1p, b1p)

    if out_pt != out:
        y2d = y2d[:, :out]
    return y2d.reshape(*orig_shape[:-1], out)


def init_decoder_params(key, emb_size, out_size, hidden_size=128,
                        dtype=jnp.float32):
    """Deterministic synthetic init (nn.Linear shapes, pre-transposed)."""
    k0, k1, k2, k3 = jax.random.split(key, 4)
    s0 = 1.0 / (emb_size ** 0.5)
    s1 = 1.0 / (hidden_size ** 0.5)
    w0 = jax.random.uniform(k0, (emb_size, hidden_size), dtype, -s0, s0)
    b0 = jax.random.uniform(k1, (hidden_size,), dtype, -s0, s0)
    w1 = jax.random.uniform(k2, (hidden_size, out_size), dtype, -s1, s1)
    b1 = jax.random.uniform(k3, (out_size,), dtype, -s1, s1)
    return w0, b0, w1, b1


if __name__ == "__main__":
    key = jax.random.PRNGKey(0)
    kx, kp = jax.random.split(key)

    # Small shapes: batch=2, seq=8, emb=32, hidden=128 (module default), out=16.
    batch, seq, emb_size, hidden_size, out_size = 2, 8, 32, 128, 16
    x = jax.random.normal(kx, (batch, seq, emb_size), dtype=jnp.float32)
    w0, b0, w1, b1 = init_decoder_params(kp, emb_size, out_size, hidden_size)

    # Reference in plain JAX (same math as the PyTorch module).
    h_ref = jnp.maximum(x @ w0 + b0, 0.0)
    y_ref = h_ref @ w1 + b1

    # f32 compute path (reference-exact).
    y = decoder_forward(x, w0, b0, w1, b1)
    y = jax.block_until_ready(y)
    assert y.shape == (batch, seq, out_size)
    assert jnp.allclose(y, y_ref, atol=1e-5, rtol=1e-5)

    # bf16 compute path: weights pre-cast once (persistently) outside the jit;
    # x stays f32 in HBM and is cast to bf16 inside the kernel.
    w0_c, w1_c = w0.astype(jnp.bfloat16), w1.astype(jnp.bfloat16)
    y_bf16 = decoder_forward(x, w0_c, b0, w1_c, b1, compute_dtype=jnp.bfloat16)
    y_bf16 = jax.block_until_ready(y_bf16)
    assert jnp.allclose(y_bf16, y_ref, atol=5e-2, rtol=5e-2)

    print("KERNEL_OK")
</pallas_src>

<mosaic_0001>
module attributes {stable_mosaic.version = 11 : i64} {
  func.func @_decoder_kernel(%arg0: i32, %arg1: i32, %arg2: memref<16x32xf32, #tpu.memory_space<vmem>>, %arg3: memref<32x128xf32, #tpu.memory_space<vmem>>, %arg4: memref<1x128xf32, #tpu.memory_space<vmem>>, %arg5: memref<128x128xf32, #tpu.memory_space<vmem>>, %arg6: memref<1x128xf32, #tpu.memory_space<vmem>>, %arg7: memref<16x128xf32, #tpu.memory_space<vmem>>, %arg8: memref<16x128xf32, #tpu.memory_space<vmem>>) attributes {dimension_semantics = [#tpu.dimension_semantics<parallel>, #tpu.dimension_semantics<arbitrary>], iteration_bounds = array<i64: 1, 1>, scalar_prefetch = 0 : i64, scratch_operands = 1 : i64, tpu.core_type = #tpu.core_type<tc>, window_params = [{transform_indices = @transform_0, window_bounds = array<i64: 16, 32>}, {pipeline_mode = #tpu.pipeline_mode<synchronous>, transform_indices = @transform_1, window_bounds = array<i64: 32, 128>}, {pipeline_mode = #tpu.pipeline_mode<synchronous>, transform_indices = @transform_2, window_bounds = array<i64: 1, 128>}, {transform_indices = @transform_3, window_bounds = array<i64: 128, 128>}, {transform_indices = @transform_4, window_bounds = array<i64: 1, 128>}, {transform_indices = @transform_5, window_bounds = array<i64: 16, 128>}]} {
    %c0_i32 = arith.constant 0 : i32
    %0 = arith.cmpi eq, %arg1, %c0_i32 : i32
    %1 = arith.extui %0 : i1 to i32
    %c0_i32_0 = arith.constant 0 : i32
    %2 = arith.cmpi ne, %1, %c0_i32_0 : i32
    scf.if %2 {
      %c0_8 = arith.constant 0 : index
      %c0_9 = arith.constant 0 : index
      %10 = vector.load %arg2[%c0_8, %c0_9] : memref<16x32xf32, #tpu.memory_space<vmem>>, vector<16x32xf32>
      %c0_10 = arith.constant 0 : index
      %c0_11 = arith.constant 0 : index
      %11 = vector.load %arg3[%c0_10, %c0_11] : memref<32x128xf32, #tpu.memory_space<vmem>>, vector<32x128xf32>
      %cst_12 = arith.constant dense<0.000000e+00> : vector<16x128xf32>
      %12 = tpu.matmul %10, %11, %cst_12 {dimension_numbers = #tpu.dot_dimension_numbers<[1], [0], [0], [1], [0, 0, 1, 1], [], []>} : vector<16x32xf32>, vector<32x128xf32>, vector<16x128xf32> -> vector<16x128xf32>
      %c0_13 = arith.constant 0 : index
      %c0_14 = arith.constant 0 : index
      %13 = vector.load %arg4[%c0_13, %c0_14] : memref<1x128xf32, #tpu.memory_space<vmem>>, vector<1x128xf32>
      %14 = vector.broadcast %13 : vector<1x128xf32> to vector<16x128xf32>
      %15 = arith.addf %12, %14 : vector<16x128xf32>
      %cst_15 = arith.constant 0.000000e+00 : f32
      %16 = vector.broadcast %cst_15 : f32 to vector<16x128xf32>
      %17 = arith.maximumf %15, %16 : vector<16x128xf32>
      %c0_16 = arith.constant 0 : index
      %c0_17 = arith.constant 0 : index
      %18 = vector.load %arg8[%c0_16, %c0_17] : memref<16x128xf32, #tpu.memory_space<vmem>>, vector<16x128xf32>
      tpu.vector_store %arg8[%c0_16, %c0_17], %17 {strides = array<i32>} : memref<16x128xf32, #tpu.memory_space<vmem>>, vector<16x128xf32>,
    } else {
    }
    %c0 = arith.constant 0 : index
    %c0_1 = arith.constant 0 : index
    %3 = vector.load %arg8[%c0, %c0_1] : memref<16x128xf32, #tpu.memory_space<vmem>>, vector<16x128xf32>
    %c0_2 = arith.constant 0 : index
    %c0_3 = arith.constant 0 : index
    %4 = vector.load %arg5[%c0_2, %c0_3] : memref<128x128xf32, #tpu.memory_space<vmem>>, vector<128x128xf32>
    %cst = arith.constant dense<0.000000e+00> : vector<16x128xf32>
    %5 = tpu.matmul %3, %4, %cst {dimension_numbers = #tpu.dot_dimension_numbers<[1], [0], [0], [1], [0, 0, 1, 1], [], []>} : vector<16x128xf32>, vector<128x128xf32>, vector<16x128xf32> -> vector<16x128xf32>
    %c0_4 = arith.constant 0 : index
    %c0_5 = arith.constant 0 : index
    %6 = vector.load %arg6[%c0_4, %c0_5] : memref<1x128xf32, #tpu.memory_space<vmem>>, vector<1x128xf32>
    %7 = vector.broadcast %6 : vector<1x128xf32> to vector<16x128xf32>
    %8 = arith.addf %5, %7 : vector<16x128xf32>
    %c0_6 = arith.constant 0 : index
    %c0_7 = arith.constant 0 : index
    %9 = vector.load %arg7[%c0_6, %c0_7] : memref<16x128xf32, #tpu.memory_space<vmem>>, vector<16x128xf32>
    tpu.vector_store %arg7[%c0_6, %c0_7], %8 {strides = array<i32>} : memref<16x128xf32, #tpu.memory_space<vmem>>, vector<16x128xf32>,
    return
  }
  func.func @transform_0(%arg0: i32, %arg1: i32) -> (i32, i32) {
    %c0_i32 = arith.constant 0 : i32
    %c0_i32_0 = arith.constant 0 : i32
    return %arg0, %c0_i32 : i32, i32
  }
  func.func @transform_1(%arg0: i32, %arg1: i32) -> (i32, i32) {
    %c0_i32 = arith.constant 0 : i32
    %c0_i32_0 = arith.constant 0 : i32
    %c0_i32_1 = arith.constant 0 : i32
    return %c0_i32, %c0_i32_0 : i32, i32
  }
  func.func @transform_2(%arg0: i32, %arg1: i32) -> (i32, i32) {
    %c0_i32 = arith.constant 0 : i32
    %c0_i32_0 = arith.constant 0 : i32
    %c0_i32_1 = arith.constant 0 : i32
    return %c0_i32, %c0_i32_0 : i32, i32
  }
  func.func @transform_3(%arg0: i32, %arg1: i32) -> (i32, i32) {
    %c0_i32 = arith.constant 0 : i32
    %c0_i32_0 = arith.constant 0 : i32
    return %c0_i32, %arg1 : i32, i32
  }
  func.func @transform_4(%arg0: i32, %arg1: i32) -> (i32, i32) {
    %c0_i32 = arith.constant 0 : i32
    %c0_i32_0 = arith.constant 0 : i32
    return %c0_i32, %arg1 : i32, i32
  }
  func.func @transform_5(%arg0: i32, %arg1: i32) -> (i32, i32) {
    %c0_i32 = arith.constant 0 : i32
    return %arg0, %arg1 : i32, i32
  }
}

</mosaic_0001>

<bundles_post_ra>
// kernel: decoder_forward.1
= control target key start
LH: loop header
LB: loop body
LE: loop exit
PB: predicated region body
PF: predicated region fallthrough
CT: control target
= control target key end

     0   :  { %vm37_vm0 = vcmask 261120   ;;  %s413_s1 = inlined_call_operand.vmem [shape: f32[32,128], index: 1, kind: input, shape index: {}]   ;;  %s414_s0 = inlined_call_operand.vmem [shape: f32[16,32], index: 0, kind: input, shape index: {}]   ;;  %s415_s3 = inlined_call_operand.vmem [shape: f32[128,128], index: 3, kind: input, shape index: {}]   ;;  %s416_s2 = inlined_call_operand.vmem [shape: f32[1,128], index: 2, kind: input, shape index: {}]   ;;  %s417_s4 = inlined_call_operand.vmem [shape: f32[1,128], index: 4, kind: input, shape index: {}]   ;;  %s418_s5 = inlined_call_operand.vmem [shape: f32[16,128], index: 5, kind: output, shape index: {}]  }
   0x1   :  { %v29_v0 = vld [vmem:[%s413_s1 + $0x18] sm:$0xff]  ;;  %v28_v1 = vld [vmem:[%s413_s1 + $0x10] sm:$0xff]  ;;  %v24_v2 = vld [vmem:[%s414_s0] sm:$0xff] }
   0x2   :  { %257 = vmatprep.subr.mxu0 %v29_v0  ;;  %v27_v3 = vld [vmem:[%s413_s1 + $0x8] sm:$0xff]  ;;  %265 = vmatprep.mubr.msk.f32.mxu0 %vm37_vm0, %v24_v2  ;;  %v140_v4 = vld [vmem:[%s415_s3 + $0x78] sm:$0xff]  ;;  %v139_v5 = vld [vmem:[%s415_s3 + $0x70] sm:$0xff] }
   0x3   :  { %258 = vmatpush3.msra.mxu0 %v29_v0  ;;  %268 = vmatprep.subr.mxu1 %v140_v4  ;;  %v26_v6 = vld [vmem:[%s413_s1] sm:$0xff]  ;;  %v138_v7 = vld [vmem:[%s415_s3 + $0x68] sm:$0xff]  ;;  %v136_v10 = vld [vmem:[%s415_s3 + $0x58] sm:$0xff] }
   0x4   :  { %259 = vmatprep.subr.mxu0 %v28_v1  ;;  %269 = vmatpush3.msra.mxu1 %v140_v4  ;;  %v25_v8 = vld [vmem:[%s414_s0 + $0x8] sm:$0xff]  ;;  %v137_v9 = vld [vmem:[%s415_s3 + $0x60] sm:$0xff]  ;;  %v135_v11 = vld [vmem:[%s415_s3 + $0x50] sm:$0xff] }
   0x5   :  { %260 = vmatpush3.msra.mxu0 %v28_v1  ;;  %270 = vmatprep.subr.mxu1 %v139_v5  ;;  %v134_v12 = vld [vmem:[%s415_s3 + $0x48] sm:$0xff]  ;;  %v133_v13 = vld [vmem:[%s415_s3 + $0x40] sm:$0xff]  ;;  %v132_v14 = vld [vmem:[%s415_s3 + $0x38] sm:$0xff] }
   0x6   :  { %261 = vmatprep.subr.mxu0 %v27_v3  ;;  %271 = vmatpush3.msra.mxu1 %v139_v5  ;;  %v131_v15 = vld [vmem:[%s415_s3 + $0x30] sm:$0xff]  ;;  %v130_v16 = vld [vmem:[%s415_s3 + $0x28] sm:$0xff]  ;;  %v129_v17 = vld [vmem:[%s415_s3 + $0x20] sm:$0xff] }
   0x7   :  { %262 = vmatpush3.msra.mxu0 %v27_v3  ;;  %272 = vmatprep.subr.mxu1 %v138_v7  ;;  %v128_v18 = vld [vmem:[%s415_s3 + $0x18] sm:$0xff]  ;;  %v127_v19 = vld [vmem:[%s415_s3 + $0x10] sm:$0xff]  ;;  %v126_v20 = vld [vmem:[%s415_s3 + $0x8] sm:$0xff] }
   0x8   :  { %263 = vmatprep.subr.mxu0 %v26_v6  ;;  %273 = vmatpush3.msra.mxu1 %v138_v7  ;;  %v125_v21 = vld [vmem:[%s415_s3] sm:$0xff] }
   0x9   :  { %264 = vmatpush3.msra.mxu0 %v26_v6  ;;  %274 = vmatprep.subr.mxu1 %v137_v9  ;;  %v229_v22 = vld [vmem:[%s416_s2] ss:$0 sm:$0xff] }
   0xa   :  { %266 = vmatmul.mubr.msk.f32.vlgmr.msra.gmra.mxu0 %vm37_vm0, %v25_v8  ;;  %275 = vmatpush3.msra.mxu1 %v137_v9  ;;  %v232_v29 = vld [vmem:[%s417_s4] ss:$0 sm:$0xff] }
   0xb   :  { %276 = vmatprep.subr.mxu1 %v136_v10 }
   0xc   :  { %277 = vmatpush3.msra.mxu1 %v136_v10 }
   0xd   :  { %278 = vmatprep.subr.mxu1 %v135_v11 }
   0xe   :  { %279 = vmatpush3.msra.mxu1 %v135_v11 }
   0xf   :  { %280 = vmatprep.subr.mxu1 %v134_v12 }
  0x10   :  { %281 = vmatpush3.msra.mxu1 %v134_v12 }
  0x11   :  { %282 = vmatprep.subr.mxu1 %v133_v13 }
  0x12   :  { %283 = vmatpush3.msra.mxu1 %v133_v13 }
  0x13   :  { %284 = vmatprep.subr.mxu1 %v132_v14 }
  0x14   :  { %285 = vmatpush3.msra.mxu1 %v132_v14 }
  0x15   :  { %286 = vmatprep.subr.mxu1 %v131_v15 }
  0x16   :  { %287 = vmatpush3.msra.mxu1 %v131_v15 }
  0x17   :  { %288 = vmatprep.subr.mxu1 %v130_v16 }
  0x18   :  { %289 = vmatpush3.msra.mxu1 %v130_v16 }
  0x19   :  { %290 = vmatprep.subr.mxu1 %v129_v17 }
  0x1a   :  { %291 = vmatpush3.msra.mxu1 %v129_v17 }
  0x1b   :  { %292 = vmatprep.subr.mxu1 %v128_v18 }
  0x1c   :  { %293 = vmatpush3.msra.mxu1 %v128_v18 }
  0x1d   :  { %294 = vmatprep.subr.mxu1 %v127_v19 }
  0x1e   :  { %295 = vmatpush3.msra.mxu1 %v127_v19 }
  0x1f   :  { %296 = vmatprep.subr.mxu1 %v126_v20 }
  0x20   :  { %297 = vmatpush3.msra.mxu1 %v126_v20 }
  0x21   :  { %298 = vmatprep.subr.mxu1 %v125_v21 }
  0x22   :  { %299 = vmatpush3.msra.mxu1 %v125_v21 }
  0xca   :  { %v267_v23 = vpop.f32.mrf.mxu0 }
  0xcb   :  { %v116_v24 = vadd.f32 %v267_v23, %v229_v22 }
  0xcc   :  { %v110_v25 = vpop.f32.mrf.mxu0 }
  0xcd   :  { %v111_v26 = vadd.f32 %v229_v22, %v110_v25  ;;  %v120_v28 = vmax.f32 %v116_v24, 0.0 }
  0xcf   :  { %v119_v27 = vmax.f32 %v111_v26, 0.0 }
  0xd1   :  { %300 = vmatprep.mubr.f32.mxu1 %v119_v27 }
  0xd2   :  { %301 = vmatmul.mubr.f32.vlgmr.msra.gmra.mxu1 %v120_v28 }
 0x192   :  { %v302_v30 = vpop.f32.mrf.mxu1 }
 0x193   :  { %v220_v31 = vadd.f32 %v302_v30, %v232_v29 }
 0x194   :  { %v214_v32 = vpop.f32.mrf.mxu1 }
 0x195   :  { %224 = vst [vmem:[%s418_s5 + $0x8] sm:$0xff] %v220_v31  ;;  %v215_v33 = vadd.f32 %v232_v29, %v214_v32 }
 0x197   :  { %223 = vst [vmem:[%s418_s5] sm:$0xff] %v215_v33 }

</bundles_post_ra>
